<compile_context>
chip_gen: v7x
topology: tpu7x:2x2x1
jax: 0.10.0
libtpu: 0.0.40
codegen_flags: <defaults>
</compile_context>

<pallas_src>
import jax
import jax.numpy as jnp
import numpy as np
from jax.experimental import pallas as pl
from jax.experimental.pallas import tpu as pltpu


def _choose_tile_s(S: int) -> int:
    """Largest power-of-two tile (<=512, multiple of 8) that divides S, else S."""
    for t in (512, 256, 128, 64, 32, 16, 8):
        if S % t == 0:
            return t
    return S


def combine_kernel(cutoff_ref, flags_ref, idx_ref, word_ref, patch_ref, out_ref):
    # cutoff_ref: (B,)        int32 SMEM  — seq position of (P+1)-th valid idx (S if none)
    # flags_ref:  (B, nt)     int32 SMEM  — 1 iff tile contains any idx >= 0
    # idx_ref:    (1, tS, 1)  int32
    # word_ref:   (1, tS, H)
    # patch_ref:  (1, P, H)   (resident across seq tiles of a batch)
    # out_ref:    (1, tS, H)
    b = pl.program_id(0)
    s = pl.program_id(1)
    tile_has_patches = flags_ref[b, s] > 0

    @pl.when(jnp.logical_not(tile_has_patches))
    def _():
        # Text-only tile: pure copy, no gather work.
        out_ref[...] = word_ref[...]

    @pl.when(tile_has_patches)
    def _():
        idx = idx_ref[0]        # (tS, 1) int32
        word = word_ref[0]      # (tS, H)
        patch = patch_ref[0]    # (P, H)
        tS = word.shape[0]
        P = patch.shape[0]

        pos = idx >= 0                                                  # (tS, 1)
        seq_pos = s * tS + jax.lax.broadcasted_iota(jnp.int32, (tS, 1), 0)
        # position is overwritten only if valid AND among the first P valid ones
        valid = pos & (seq_pos < cutoff_ref[b])                         # (tS, 1)

        # gather patch rows via one-hot matmul on the MXU
        idx_c = jnp.clip(idx, 0, P - 1)                                 # (tS, 1)
        patch_iota = jax.lax.broadcasted_iota(jnp.int32, (tS, P), 1)
        onehot = (idx_c == patch_iota).astype(patch.dtype)              # (tS, P) exact 0/1
        gathered = jnp.dot(onehot, patch,
                           preferred_element_type=jnp.float32)          # (tS, H) f32

        out_ref[0] = jnp.where(valid, gathered.astype(word.dtype), word).astype(out_ref.dtype)


def combine_embeddings(word_embeddings, patch_embeddings, image_patches_indices,
                       tile_s=None):
    """word_embeddings [B,S,H], patch_embeddings [B,P,H] (or list), indices [B,S] int."""
    if isinstance(patch_embeddings, (list, tuple)):
        patch_embeddings = jnp.stack(patch_embeddings)

    B, S, H = word_embeddings.shape
    _, P, _ = patch_embeddings.shape
    idx = image_patches_indices.astype(jnp.int32).reshape(B, S)

    if tile_s is None:
        tile_s = _choose_tile_s(S)
    assert S % tile_s == 0, "tile_s must divide S"
    nt = S // tile_s

    # --- cheap O(S) host-side (XLA) scalar prep, prefetched into SMEM ---
    pos = idx >= 0                                              # (B, S)
    csum = jnp.cumsum(pos.astype(jnp.int32), axis=1)            # inclusive valid count
    over = csum > P
    cutoff = jnp.where(jnp.any(over, axis=1),
                       jnp.argmax(over, axis=1), S).astype(jnp.int32)   # (B,)
    tile_flags = jnp.any(pos.reshape(B, nt, tile_s), axis=2).astype(jnp.int32)  # (B, nt)

    idx3 = idx.reshape(B, S, 1)

    return pl.pallas_call(
        combine_kernel,
        out_shape=jax.ShapeDtypeStruct((B, S, H), word_embeddings.dtype),
        grid_spec=pltpu.PrefetchScalarGridSpec(
            num_scalar_prefetch=2,                       # cutoff, tile_flags -> SMEM
            grid=(B, nt),
            in_specs=[
                pl.BlockSpec((1, tile_s, 1), lambda b, s, *_: (b, s, 0)),  # indices
                pl.BlockSpec((1, tile_s, H), lambda b, s, *_: (b, s, 0)),  # word
                pl.BlockSpec((1, P, H),      lambda b, s, *_: (b, 0, 0)),  # patch (resident per b)
            ],
            out_specs=pl.BlockSpec((1, tile_s, H), lambda b, s, *_: (b, s, 0)),
        ),
        compiler_params=pltpu.CompilerParams(
            dimension_semantics=("parallel", "parallel")),
    )(cutoff, tile_flags, idx3, word_embeddings, patch_embeddings)


def _reference(word, patch, indices):
    # numpy reimplementation of the PyTorch loop (for verification)
    out = np.array(word).copy()
    patch = np.array(patch)
    indices = np.array(indices)
    for b in range(out.shape[0]):
        dst = np.nonzero(indices[b] >= 0)[0]
        src = indices[b][dst]
        if src.shape[0] > patch[b].shape[0]:
            src = src[: patch[b].shape[0]]
            dst = dst[: len(src)]
        out[b][dst] = patch[b][src]
    return out


if __name__ == "__main__":
    B, S, H, P = 2, 16, 32, 6
    key = jax.random.PRNGKey(0)
    k1, k2 = jax.random.split(key)

    word = jax.random.normal(k1, (B, S, H), dtype=jnp.float32)
    patch = jax.random.normal(k2, (B, P, H), dtype=jnp.float32)

    # batch 0: 6 image positions (exactly P), all in the first seq tile
    #          (second tile is text-only -> exercises the pl.when skip path)
    # batch 1: 10 image positions spanning both tiles (> P -> exercises truncation)
    idx_np = -np.ones((B, S), dtype=np.int32)
    idx_np[0, 2:8] = np.arange(6)
    idx_np[1, 0:10] = np.concatenate([np.arange(6), np.array([0, 1, 2, 3])])
    indices = jnp.asarray(idx_np)

    out = combine_embeddings(word, patch, indices, tile_s=8)
    out = jax.block_until_ready(out)

    expected = _reference(word, patch, indices)
    np.testing.assert_allclose(np.array(out), expected, rtol=1e-6, atol=1e-6)
    print("KERNEL_OK")
</pallas_src>

<mosaic_0001>
module attributes {stable_mosaic.version = 11 : i64} {
  func.func @combine_kernel(%arg0: i32, %arg1: i32, %arg2: memref<2xi32, #tpu.memory_space<smem>>, %arg3: memref<2x2xi32, #tpu.memory_space<smem>>, %arg4: memref<1x8x1xi32, #tpu.memory_space<vmem>>, %arg5: memref<1x8x32xf32, #tpu.memory_space<vmem>>, %arg6: memref<1x6x32xf32, #tpu.memory_space<vmem>>, %arg7: memref<1x8x32xf32, #tpu.memory_space<vmem>>) attributes {dimension_semantics = [#tpu.dimension_semantics<parallel>, #tpu.dimension_semantics<parallel>], iteration_bounds = array<i64: 2, 2>, scalar_prefetch = 2 : i64, scratch_operands = 0 : i64, tpu.core_type = #tpu.core_type<tc>, window_params = [{transform_indices = @transform_0, window_bounds = array<i64: 1, 8, 1>}, {transform_indices = @transform_1, window_bounds = array<i64: 1, 8, 32>}, {transform_indices = @transform_2, window_bounds = array<i64: 1, 6, 32>}, {transform_indices = @transform_3, window_bounds = array<i64: 1, 8, 32>}]} {
    %0 = arith.index_cast %arg0 : i32 to index
    %1 = arith.index_cast %arg1 : i32 to index
    %2 = memref.load %arg3[%0, %1] : memref<2x2xi32, #tpu.memory_space<smem>>
    %c0_i32 = arith.constant 0 : i32
    %3 = arith.cmpi sgt, %2, %c0_i32 : i32
    %true = arith.constant true
    %4 = arith.xori %3, %true : i1
    %5 = arith.extui %4 : i1 to i32
    %c0_i32_0 = arith.constant 0 : i32
    %6 = arith.cmpi ne, %5, %c0_i32_0 : i32
    scf.if %6 {
      %c0 = arith.constant 0 : index
      %c0_2 = arith.constant 0 : index
      %c0_3 = arith.constant 0 : index
      %9 = vector.load %arg5[%c0, %c0_2, %c0_3] : memref<1x8x32xf32, #tpu.memory_space<vmem>>, vector<1x8x32xf32>
      %c0_4 = arith.constant 0 : index
      %c0_5 = arith.constant 0 : index
      %c0_6 = arith.constant 0 : index
      %10 = vector.load %arg7[%c0_4, %c0_5, %c0_6] : memref<1x8x32xf32, #tpu.memory_space<vmem>>, vector<1x8x32xf32>
      tpu.vector_store %arg7[%c0_4, %c0_5, %c0_6], %9 {strides = array<i32>} : memref<1x8x32xf32, #tpu.memory_space<vmem>>, vector<1x8x32xf32>,
    } else {
    }
    %7 = arith.extui %3 : i1 to i32
    %c0_i32_1 = arith.constant 0 : i32
    %8 = arith.cmpi ne, %7, %c0_i32_1 : i32
    scf.if %8 {
      %c0 = arith.constant 0 : index
      %c0_2 = arith.constant 0 : index
      %c0_3 = arith.constant 0 : index
      %9 = vector.load %arg4[%c0, %c0_2, %c0_3] : memref<1x8x1xi32, #tpu.memory_space<vmem>>, vector<1x8x1xi32>
      %10 = vector.shape_cast %9 : vector<1x8x1xi32> to vector<8x1xi32>
      %c0_4 = arith.constant 0 : index
      %c0_5 = arith.constant 0 : index
      %c0_6 = arith.constant 0 : index
      %11 = vector.load %arg5[%c0_4, %c0_5, %c0_6] : memref<1x8x32xf32, #tpu.memory_space<vmem>>, vector<1x8x32xf32>
      %12 = vector.shape_cast %11 : vector<1x8x32xf32> to vector<8x32xf32>
      %c0_7 = arith.constant 0 : index
      %c0_8 = arith.constant 0 : index
      %c0_9 = arith.constant 0 : index
      %13 = vector.load %arg6[%c0_7, %c0_8, %c0_9] : memref<1x6x32xf32, #tpu.memory_space<vmem>>, vector<1x6x32xf32>
      %14 = vector.shape_cast %13 : vector<1x6x32xf32> to vector<6x32xf32>
      %c0_i32_10 = arith.constant 0 : i32
      %15 = vector.broadcast %c0_i32_10 : i32 to vector<8x1xi32>
      %16 = arith.cmpi sge, %10, %15 : vector<8x1xi32>
      %c8_i32 = arith.constant 8 : i32
      %17 = arith.muli %arg1, %c8_i32 : i32
      %18 = tpu.iota {dimensions = array<i32: 0>} : vector<8x1xi32>
      %19 = vector.broadcast %17 : i32 to vector<8x1xi32>
      %20 = arith.addi %19, %18 : vector<8x1xi32>
      %21 = arith.index_cast %arg0 : i32 to index
      %22 = memref.load %arg2[%21] : memref<2xi32, #tpu.memory_space<smem>>
      %23 = vector.broadcast %22 : i32 to vector<8x1xi32>
      %24 = arith.cmpi slt, %20, %23 : vector<8x1xi32>
      %25 = arith.andi %16, %24 : vector<8x1xi1>
      %c0_i32_11 = arith.constant 0 : i32
      %c5_i32 = arith.constant 5 : i32
      %26 = vector.broadcast %c0_i32_11 : i32 to vector<8x1xi32>
      %27 = arith.maxsi %26, %10 : vector<8x1xi32>
      %28 = vector.broadcast %c5_i32 : i32 to vector<8x1xi32>
      %29 = arith.minsi %28, %27 : vector<8x1xi32>
      %30 = tpu.iota {dimensions = array<i32: 1>} : vector<8x6xi32>
      %31 = vector.broadcast %29 : vector<8x1xi32> to vector<8x6xi32>
      %32 = arith.cmpi eq, %31, %30 : vector<8x6xi32>
      %33 = arith.extui %32 : vector<8x6xi1> to vector<8x6xi32>
      %34 = arith.sitofp %33 : vector<8x6xi32> to vector<8x6xf32>
      %cst = arith.constant dense<0.000000e+00> : vector<8x32xf32>
      %35 = tpu.matmul %34, %14, %cst {dimension_numbers = #tpu.dot_dimension_numbers<[1], [0], [0], [1], [0, 0, 1, 1], [], []>} : vector<8x6xf32>, vector<6x32xf32>, vector<8x32xf32> -> vector<8x32xf32>
      %36 = vector.shape_cast %25 : vector<8x1xi1> to vector<8x1xi1>
      %37 = vector.broadcast %36 : vector<8x1xi1> to vector<8x32xi1>
      %38 = arith.select %37, %35, %12 : vector<8x32xi1>, vector<8x32xf32>
      %c0_12 = arith.constant 0 : index
      %c0_13 = arith.constant 0 : index
      %c0_14 = arith.constant 0 : index
      %39 = vector.load %arg7[%c0_12, %c0_13, %c0_14] : memref<1x8x32xf32, #tpu.memory_space<vmem>>, vector<1x8x32xf32>
      %40 = vector.shape_cast %39 : vector<1x8x32xf32> to vector<8x32xf32>
      %41 = vector.shape_cast %38 : vector<8x32xf32> to vector<1x8x32xf32>
      tpu.vector_store %arg7[%c0_12, %c0_13, %c0_14], %41 {strides = array<i32>} : memref<1x8x32xf32, #tpu.memory_space<vmem>>, vector<1x8x32xf32>,
    } else {
    }
    return
  }
  func.func @transform_0(%arg0: i32, %arg1: i32, %arg2: memref<2xi32, #tpu.memory_space<smem>>, %arg3: memref<2x2xi32, #tpu.memory_space<smem>>) -> (i32, i32, i32) {
    %c0_i32 = arith.constant 0 : i32
    %c0_i32_0 = arith.constant 0 : i32
    return %arg0, %arg1, %c0_i32 : i32, i32, i32
  }
  func.func @transform_1(%arg0: i32, %arg1: i32, %arg2: memref<2xi32, #tpu.memory_space<smem>>, %arg3: memref<2x2xi32, #tpu.memory_space<smem>>) -> (i32, i32, i32) {
    %c0_i32 = arith.constant 0 : i32
    %c0_i32_0 = arith.constant 0 : i32
    return %arg0, %arg1, %c0_i32 : i32, i32, i32
  }
  func.func @transform_2(%arg0: i32, %arg1: i32, %arg2: memref<2xi32, #tpu.memory_space<smem>>, %arg3: memref<2x2xi32, #tpu.memory_space<smem>>) -> (i32, i32, i32) {
    %c0_i32 = arith.constant 0 : i32
    %c0_i32_0 = arith.constant 0 : i32
    %c0_i32_1 = arith.constant 0 : i32
    return %arg0, %c0_i32, %c0_i32_0 : i32, i32, i32
  }
  func.func @transform_3(%arg0: i32, %arg1: i32, %arg2: memref<2xi32, #tpu.memory_space<smem>>, %arg3: memref<2x2xi32, #tpu.memory_space<smem>>) -> (i32, i32, i32) {
    %c0_i32 = arith.constant 0 : i32
    %c0_i32_0 = arith.constant 0 : i32
    return %arg0, %arg1, %c0_i32 : i32, i32, i32
  }
}

</mosaic_0001>

<bundles_post_ra>
// kernel: tpu_custom_call.1
= control target key start
LH: loop header
LB: loop body
LE: loop exit
PB: predicated region body
PF: predicated region fallthrough
CT: control target
= control target key end

     0   :  { %s936_s0 = inlined_call_operand.vmem [shape: s32[2], index: 0, kind: input, shape index: {}]   ;;  %s937_s2 = inlined_call_operand.vmem [shape: s32[2,16,1], index: 2, kind: input, shape index: {}]   ;;  %s938_s3 = inlined_call_operand.vmem [shape: f32[2,16,32], index: 3, kind: input, shape index: {}]   ;;  %s939_s4 = inlined_call_operand.vmem [shape: f32[2,6,32], index: 4, kind: input, shape index: {}]   ;;  %s940_s5 = inlined_call_operand.hbm [shape: f32[2,16,32], index: 5, kind: output, shape index: {}]   ;;  %s941_s1 = inlined_call_operand.vmem [shape: s32[2,2], index: 1, kind: input, shape index: {}]  }
   0x1   :  { %s10_s20 = sshll.u32 %s936_s0, 4  ;;  %s14_s23 = sshll.u32 %s941_s1, 4  ;;  %s11_s20 = int_to_ptr.vmem [resolvable:$true] %s10_s20  ;;  %s15_s23 = int_to_ptr.vmem [resolvable:$true] %s14_s23 }
   0x2   :  { %s615_s24 = scalar_lea.vmem %s11_s20, 16  ;;  %p620_p1 = scmp.lt.s32.totalorder %s11_s20, %s11_s20 }
   0x3   :  { %p616_p0 = scmp.ne.s32.totalorder %s11_s20, %s615_s24  ;;  %p621_p2 = scmp.lt.s32.totalorder %s615_s24, %s615_s24 }
   0x5   :  { %p622_p3 = por %p621_p2, %p620_p1 }
   0x7   :  { %p623_p4 = pnand %p622_p3, %p616_p0 }
   0x9   :  { %626 = shalt.err (!%p623_p4)  }
   0xa   :  { %s737_s25 = smov [#allocation3]   ;;  %s627_s26 = scalar_lea.vmem %s15_s23, 32 }
   0xb   :  { %13 = dma.vmem_to_smem %s11_s20, 16, %s737_s25, [#allocation2] }
   0xc   :  { %p628_p5 = scmp.ne.s32.totalorder %s15_s23, %s627_s26  ;;  %p632_p6 = scmp.lt.s32.totalorder %s15_s23, %s15_s23 }
   0xd   :  { %p633_p7 = scmp.lt.s32.totalorder %s627_s26, %s627_s26 }
   0xf   :  { %p634_p8 = por %p633_p7, %p632_p6 }
  0x11   :  { %p635_p9 = pnand %p634_p8, %p628_p5 }
  0x13   :  { %638 = shalt.err (!%p635_p9)  }
  0x14   :  { %s738_s0 = smov [#allocation4]  }
  0x15   :  { %17 = dma.vmem_to_smem %s15_s23, 32, %s738_s0, [#allocation2] }
  0x16   :  { %699 = dma.done.wait [#allocation2], 48 }
  0x17   :  { %700 = vsyncadd [#allocation2], 4294967248 }
  0x18   :  { %19 = sfence }
  0x19   :  { %20 = vsyncpa [#allocation6], 0 }
  0x1a   :  { %22 = vsyncpa [#allocation6 + $0x1], 0  ;;  %s779_s1 = smov 0   ;;  %s781_s27 = smov 0  }
  0x1b   :  { %s783_s28 = smov 0   ;;  %s785_s29 = smov 0  }
  0x1c   :  { %s787_s30 = smov 0   ;;  %s789_s6 = smov 0  }
  0x1d   :  { %s791_s7 = smov 0   ;;  %s793_s8 = smov 0  }
  0x1e LB: > { %948 = sst [smem:[#allocation9_spill]] %s715_s28  ;;  %s508_s9 = sadd.s32 4294967295, %s735_s8   ;;  %s735_s8 = sphi %s793_s8, %s28_s8   ;;  %s731_s7 = sphi %s791_s7, %s962_s7   ;;  %s727_s6 = sphi %s789_s6, %s961_s6   ;;  %s723_s30 = sphi %s787_s30, %s960_s30   ;;  %s719_s29 = sphi %s785_s29, %s959_s29   ;;  %s715_s28 = sphi %s783_s28, %s965_s28   ;;  %s711_s27 = sphi %s781_s27, %s964_s27   ;;  %s707_s1 = sphi %s779_s1, %s963_s1  }
  0x1f   : > { %949 = sst [smem:[#allocation10_spill]] %s727_s6  ;;  %s509_s10 = sadd.s32 4294967294, %s735_s8  }
  0x20   : > { %950 = sst [smem:[#allocation11_spill]] %s731_s7  ;;  %s37_s11 = sadd.s32 1, %s727_s6 }
  0x21   : > { %p38_p10 = scmp.ge.s32.totalorder %s37_s11, 2  ;;  %s40_s12 = sadd.s32 1, %s731_s7 }
  0x22   : > { %p141_p11 = scmp.ne.s32.totalorder %s715_s28, %s711_s27  ;;  %p142_p12 = scmp.eq.s32.totalorder %s508_s9, 3 }
  0x23   : > { %s967_s11 = smov (%p38_p10, %s37_s11), 0  ;;  %s969_s12 = smov (!%p38_p10, %s40_s12), %s731_s7 }
  0x24   : > { %951 = sst [smem:[#allocation12_spill]] %s967_s11  ;;  %s127_s13 = ssub.s32 %s727_s6, %s967_s11 }
  0x25   : > { %p830_p13 = por %p142_p12, %p141_p11  ;;  %p42_p0 = scmp.ge.s32.totalorder %s969_s12, 2 }
  0x26   : > { %p147_p1 = scmp.ne.s32.totalorder %s711_s27, %s707_s1  ;;  %p148_p2 = scmp.eq.s32.totalorder %s509_s10, 3 }
  0x27   : > { %p512_p3 = scmp.ge.s32.totalorder %s735_s8, 1  ;;  %s971_s12 = smov (%p42_p0, %s969_s12), 0 }
  0x28   : > { %953 = sst [smem:[#allocation13_spill]] %s971_s12  ;;  %p839_p4 = por %p148_p2, %p147_p1 }
  0x29   : > { %p195_p5 = scmp.lt.s32.totalorder %s735_s8, 5  ;;  %s126_s16 = ssub.s32 %s731_s7, %s971_s12 }
  0x2a   : > { %s131_s17 = sadd.s32 1, %s715_s28  ;;  %s128_s18 = sor.u32 %s127_s13, %s126_s16 }
  0x2b   : > { %p196_p6 = pnand %p512_p3, %p195_p5  ;;  %p129_p7 = scmp.eq.s32.totalorder %s128_s18, 0 }
  0x2c   : > { %s945_s20 = sand.u32 (!%p196_p6), 1, %s711_s27   ;;  %p234_p8 = scmp.lt.s32.totalorder (!%p196_p6), %s723_s30, 1 }
  0x2d   : > { %s848_s19 = scalar_select %p129_p7, %s715_s28, %s131_s17  }
  0x2e   : > { %199 = sbr.rel (%p196_p6) target bundleno = 450 (0x1c2), region = 32  ;;  %s513_s21 = sshll.u32 (!%p196_p6), %s945_s20, 3 }
  0x2f   : > { %955 = sst [smem:[#allocation14_spill]] %s848_s19  ;;  %p236_p9 = scmp.lt.s32.totalorder (!%p196_p6), %s719_s29, 1 }
  0x30   : > { %s254_s22 = sshra.s32 (!%p196_p6), %s719_s29, 7  ;;  %s259_s28 = sand.u32 (!%p196_p6), 127, %s719_s29 }
  0x31   : > { %s256_s17 = sadd.s32 (!%p196_p6), %s723_s30, %s254_s22 }
  0x32   : > { %s519_s19 = sshll.u32 (!%p196_p6), %s256_s17, 7 }
  0x35   : > { %s235_s23 = scalar_select %p234_p8, %s723_s30, 1 }
  0x36   : > { %s237_s24 = scalar_select %p236_p9, %s719_s29, 1 }
  0x37   : > { %s514_s25 = sshll.u32 %s235_s23, 1  ;;  %s518_s26 = sshll.u32 %s235_s23, 3 }
  0x38   : > { %s239_s0 = sadd.s32 %s514_s25, %s237_s24  ;;  %s861_s13 = scalar_lea.vmem %s939_s4, %s518_s26 }
  0x39   : > { %s515_s16 = sshll.u32 %s239_s0, 3  ;;  %s260_s23 = sadd.s32 %s519_s19, %s259_s28 }
  0x3a   : > { %s241_s11 = scalar_lea.vmem %s937_s2, %s515_s16  ;;  %s870_s6 = scalar_lea.vmem %s938_s3, %s515_s16 }
  0x3b   : > { %s261_s24 = sld [smem:[#allocation4 + %s260_s23]]  ;;  %s873_s25 = scalar_lea.vmem [#allocation5], %s513_s21 }
  0x41   : > { %p520_p10 = scmp.gt.s32.totalorder %s261_s24, 0 }
  0x42   : > { %v267_v0 = vld [vmem:[%s870_s6] sm:$0xff] (!%p520_p10)  ;;  %vm268_vm0 = vcmask (!%p520_p10), 261120  }
  0x43   : > { %266 = sbr.rel (%p520_p10) target bundleno = 74 (0x4a), region = 36  ;;  %269 = vst.msk [vmem:[%s873_s25] sm:$0xff] (!%p520_p10), %vm268_vm0, %v267_v0 }
  0x4a PF: > { %p521_p11 = scmp.le.s32.totalorder %s261_s24, 0 }
  0x4b   : > { %v273_v1 = vld [vmem:[%s241_s11] sm:$0xff] (!%p521_p11)  ;;  %s522_s7 = sshll.u32 (!%p521_p11), %s719_s29, 3  ;;  %v278_v2 = vlaneseq (!%p521_p11)  ;;  %s282_s28 = sld [smem:[#allocation3 + %s723_s30]] (!%p521_p11)  ;;  %v739_v3 = vmov (!%p521_p11), 0   ;;  %v740_v5 = vmov (!%p521_p11), 0.0   ;;  %vm302_vm4 = vcmask (!%p521_p11), 1045504  }
  0x4c   : > { %272 = sbr.rel (%p521_p11) target bundleno = 424 (0x1a8), region = 40  ;;  %614 = vset.pattern.permute.xlu0 (!%p521_p11), %v739_v3  ;;  %v280_v4 = vstv (!%p521_p11), %s522_s7  ;;  %vm286_vm1 = vcmp.gt.s32.totalorder (!%p521_p11), %v273_v1, 0  ;;  %533 = vmatprep.subr.mxu0 (!%p521_p11), %v740_v5  ;;  %vm276_vm3 = vcmp.ge.s32.totalorder (!%p521_p11), %v273_v1, 0  ;;  %v275_v10 = vld [vmem:[%s861_s13] sm:$0x3f] (!%p521_p11)  ;;  %vm741_vm5 = vmmov (!%p521_p11), 0  }
  0x4d   : > { %v279_v6 = vshrl.u32 (!%p521_p11), %v278_v2, 7  ;;  %v287_v7 = vsel (!%p521_p11), %vm286_vm1, %v273_v1, 0  ;;  %534 = vmatpush3.msk.msra.mxu0 (!%p521_p11), %vm302_vm4, %v275_v10  ;;  %535 = vmatprep.mubr.msk.f32.mxu0 (!%p521_p11), %vm741_vm5, %v740_v5  ;;  %v291_v13 = vand.u32 (!%p521_p11), 127, %v278_v2  ;;  %vm298_vm8 = vcmask (!%p521_p11), 48128   ;;  %v274_v17 = vld [vmem:[%s870_s6] sm:$0xff] (!%p521_p11) }
  0x4e   : > { %vm288_vm2 = vcmp.lt.s32.totalorder (!%p521_p11), %v287_v7, 5  ;;  %vm382_vm10 = vcmask (!%p521_p11), 261120  }
  0x4f   : > { %v281_v8 = vadd.s32 (!%p521_p11), %v280_v4, %v279_v6  ;;  %v289_v9 = vsel (!%p521_p11), %vm288_vm2, %v287_v7, 5 }
  0x50   : > { %293 = vperm.xlu0 (!%p521_p11), %614, %v289_v9  }
  0x51   : > { %v283_v11 = vstv (!%p521_p11), %s282_s28 }
  0x52   : > { %vm284_vm6 = vcmp.lt.s32.totalorder (!%p521_p11), %v281_v8, %v283_v11 }
  0x53   : > { %vm285_vm7 = vmand %vm276_vm3, %vm284_vm6 }
  0x54   : > { %v376_v12 = vsel %vm285_vm7, 1, %v739_v3 }
  0x55   : > { %378 = vperm.xlu0 %614, %v376_v12  }
  0xcf   : > { %v294_v14 = vpop.permute.xlu0 %293 }
  0xd0   : > { %vm295_vm9 = vcmp.eq.s32.totalorder %v294_v14, %v291_v13 }
  0xd1   : > { %v523_v15 = vsel %vm295_vm9, 1.0, %v740_v5 }
  0xd2   : > { %536 = vmatmul.mubr.msk.f32.vlgmr.msra.gmra.mrb[0].mxu0 %vm298_vm8, %v523_v15 }
  0xd4   : > { %v379_v16 = vpop.permute.xlu0 %378 }
  0xd5   : > { %vm380_vm11 = vcmp.eq.s32.totalorder %v379_v16, 1 }
 0x1a5   : > { %v372_v18 = vpop.f32.mrb[0].mxu0 }
 0x1a6   : > { %v381_v19 = vsel %vm380_vm11, %v372_v18, %v274_v17  ;;  %v537_v20 = vpop.f32.mrb[1].mxu0 }
 0x1a7   : > { %383 = vst.msk [vmem:[%s873_s25] sm:$0xff] %vm382_vm10, %v381_v19 }
 0x1a8 PF: > { %s527_s11 = sshll.u32 %s723_s30, 1  ;;  %s400_s19 = sshll.u32 %s873_s25, 4  ;;  %s885_s19 = int_to_ptr.vmem [resolvable:$true] %s400_s19 }
 0x1a9   : > { %s396_s12 = sadd.s32 %s719_s29, %s527_s11  ;;  %s956_s26 = sand.u32 1, %s711_s27  }
 0x1aa   : > { %s528_s20 = sshll.u32 %s396_s12, 7  ;;  %s385_s0 = scalar_lea.sflag [#allocation6], %s956_s26 }
 0x1ab   : > { %s398_s22 = scalar_lea.hbm %s940_s5, %s528_s20  ;;  %s639_s9 = scalar_lea.vmem %s885_s19, 128 }
 0x1ac   : > { %p640_p12 = scmp.ne.s32.totalorder %s885_s19, %s639_s9  ;;  %s742_s30 = smov [#allocation5]  }
 0x1ad   : > { %s643_s29 = sshll.u32 %s742_s30, 4  ;;  %s644_s29 = int_to_ptr.vmem [resolvable:$false] %s643_s29 }
 0x1ae   : > { %p641_p0 = pnand %p640_p12, %p830_p13  ;;  %s645_s10 = scalar_lea.vmem %s644_s29, 256 }
 0x1af   : > { %p646_p2 = scmp.lt.s32.totalorder %s885_s19, %s644_s29  ;;  %p647_p3 = scmp.lt.s32.totalorder %s645_s10, %s639_s9 }
 0x1b0   : > { %p642_p1 = pneg %p641_p0 }
 0x1b1   : > { %p648_p5 = por %p647_p3, %p646_p2 }
 0x1b3   : > { %p649_p6 = pnand %p648_p5, %p642_p1 }
 0x1b5   : > { %652 = shalt.err (!%p649_p6)
}
 0x1b6   : > { %s653_s13 = scalar_lea.hbm %s398_s22, 128  ;;  %s657_s18 = scalar_lea.hbm %s940_s5, 512 }
 0x1b7   : > { %p654_p7 = scmp.ne.s32.totalorder %s398_s22, %s653_s13  ;;  %p658_p10 = scmp.lt.u32.totalorder %s398_s22, %s940_s5 }
 0x1b8   : > { %p659_p11 = scmp.lt.u32.totalorder %s657_s18, %s653_s13  ;;  %p661_p0 = scmp.lt.u32.totalorder %s653_s13, %s398_s22 }
 0x1b9   : > { %p655_p8 = pnand %p654_p7, %p830_p13 }
 0x1ba   : > { %p660_p12 = por %p659_p11, %p658_p10 }
 0x1bb   : > { %p656_p9 = pneg %p655_p8 }
 0x1bc   : > { %p662_p2 = por %p661_p0, %p660_p12 }
 0x1be   : > { %p663_p1 = pnand %p662_p2, %p656_p9 }
 0x1c0   : > { %666 = shalt.err (!%p663_p1)
}
 0x1c1   : > { %538 = dma.vmem_to_hbm [thread:$0]  (%p830_p13), %s885_s19, 128, %s398_s22, %s385_s0  }
 0x1c2 PF: > { %p544_p3 = scmp.ge.s32.totalorder %s735_s8, 2  ;;  %s412_s25 = sand.u32 1, %s707_s1  }
 0x1c3   : > { %s413_s7 = scalar_lea.sflag [#allocation6], %s412_s25 }
 0x1c4   : > { %p541_p5 = pnand %p544_p3, %p839_p4 }
 0x1c6   : > { %702 = dma.done.wait (!%p541_p5), %s413_s7, 128  }
 0x1c7   : > { %704 = vsyncadd (!%p541_p5), %s413_s7, 4294967168  ;;  %s28_s8 = sadd.s32 1, %s735_s8   ;;  %s957_s28 = sld [smem:[#allocation9_spill]] }
 0x1c8   : > { %p25_p6 = scmp.ge.s32.totalorder %s28_s8, 6   ;;  %s958_s11 = sld [smem:[#allocation14_spill]] }
 0x1c9   : > { %s959_s29 = sld [smem:[#allocation10_spill]]  ;;  %s960_s30 = sld [smem:[#allocation11_spill]] }
 0x1ca   : > { %s961_s6 = sld [smem:[#allocation12_spill]]  ;;  %s962_s7 = sld [smem:[#allocation13_spill]] }
 0x1cb   : > { %s963_s1 = smov %s711_s27  ;;  %27 = sbr.rel (!%p25_p6) target bundleno = 30 (0x1e), region = 81 }
 0x1cd   : > { %s964_s27 = smov %s957_s28 }
 0x1ce   : > { %s965_s28 = smov %s958_s11 }
 0x1d2   :  { %418 = vsyncpa [#allocation6], 1 }
 0x1d3   :  { %420 = vsyncpa [#allocation6 + $0x1], 1 }

</bundles_post_ra>
